<compile_context>
chip_gen: v5e
topology: v5e:2x2
jax: 0.10.0
libtpu: 0.0.40
codegen_flags: <defaults>
</compile_context>

<pallas_src>
import functools
import math

import numpy as np

import jax
import jax.numpy as jnp
from jax.experimental import pallas as pl
from jax.experimental.pallas import tpu as pltpu

_LOG_10000 = math.log(10000.0)
_HALF_PI = math.pi / 2.0


def _posenc_kernel(freq_ref, bias_ref, x_ref, o_ref, *, fold: int):
    # x_ref / o_ref: (TB, TR, FD) tile of the folded array (FD = fold * d_model).
    # freq_ref / bias_ref: (1, 1, FD) per-lane inverse frequency / phase-bias.
    _, tr, fd = x_ref.shape

    # Original sequence position of the first sub-row packed into each folded
    # row of this tile; the per-lane remainder (lane // d_model) is folded into
    # bias_ref so only a single fused multiply-add + sin is needed per element.
    base = pl.program_id(1) * (tr * fold)
    row = jax.lax.broadcasted_iota(jnp.int32, (1, tr, fd), 1)
    pos = (row * fold + base).astype(jnp.float32)

    pe = jnp.sin(pos * freq_ref[...] + bias_ref[...])  # (1, TR, FD) f32
    o_ref[...] = (x_ref[...].astype(jnp.float32) + pe).astype(o_ref.dtype)


def positional_encoding(
    x: jax.Array,
    *,
    max_len: int = 5000,
    tile_bytes_target: int = 2 * 1024 * 1024,
) -> jax.Array:
    """Pallas equivalent of PositionalEncoding(d_model)(x), eval-mode forward."""
    assert x.ndim == 3, "expected (batch, seq_len, d_model)"
    b, s, d = x.shape
    assert s <= max_len, "seq_len exceeds max_len"
    itemsize = jnp.dtype(x.dtype).itemsize

    # Fold factor: smallest f with (f * d) % 128 == 0, provided seq divides.
    fold = 128 // math.gcd(d, 128)
    if fold > 1 and (s % fold != 0):
        fold = 1  # fall back to the unfolded (possibly lane-masked) layout
    sf = s // fold
    fd = fold * d

    # Per-lane constants of the folded layout (host-side, tiny).
    lane = np.arange(fd)
    col = lane % d                      # feature column within d_model
    sub = lane // d                     # sub-position within a folded row
    two_k = (col - (col % 2)).astype(np.float64)
    inv_freq = np.exp(-two_k * _LOG_10000 / d)
    phase = (col % 2) * _HALF_PI
    freq = inv_freq.reshape(1, 1, fd).astype(np.float32)
    bias = (sub * inv_freq + phase).reshape(1, 1, fd).astype(np.float32)

    xf = x.reshape(b, sf, fd)           # contiguous reshape: free metadata op

    # Seq tile: full extent if it fits ~tile_bytes_target, else 8-aligned rows.
    row_bytes = fd * itemsize
    tile_rows = max(1, tile_bytes_target // row_bytes)
    if tile_rows >= sf:
        tr = sf
    else:
        tr = max(8, (tile_rows // 8) * 8)
        if tr >= sf:
            tr = sf
    # Batch tile: keep one tile near the target so double-buffered in+out
    # (~4x a tile) stays inside the default scoped VMEM on every generation.
    tb = max(1, min(b, tile_bytes_target // max(1, tr * row_bytes)))

    grid = (pl.cdiv(b, tb), pl.cdiv(sf, tr))

    out = pl.pallas_call(
        functools.partial(_posenc_kernel, fold=fold),
        out_shape=jax.ShapeDtypeStruct((b, sf, fd), x.dtype),
        grid_spec=pltpu.PrefetchScalarGridSpec(
            num_scalar_prefetch=0,
            grid=grid,
            in_specs=[
                pl.BlockSpec((1, 1, fd), lambda i, j: (0, 0, 0)),
                pl.BlockSpec((1, 1, fd), lambda i, j: (0, 0, 0)),
                pl.BlockSpec((tb, tr, fd), lambda i, j: (i, j, 0)),
            ],
            out_specs=pl.BlockSpec((tb, tr, fd), lambda i, j: (i, j, 0)),
        ),
        compiler_params=pltpu.CompilerParams(
            dimension_semantics=("parallel", "parallel"),
        ),
    )(jnp.asarray(freq), jnp.asarray(bias), xf)

    return out.reshape(b, s, d)


def _pe_table_reference(seq_len: int, d_model: int) -> jax.Array:
    """Plain-JAX replica of the PyTorch pe buffer (for correctness checks)."""
    position = jnp.arange(seq_len, dtype=jnp.float32)[:, None]
    div_term = jnp.exp(
        jnp.arange(0, d_model, 2, dtype=jnp.float32) * (-_LOG_10000 / d_model)
    )
    ang = position * div_term
    pe = jnp.zeros((seq_len, d_model), jnp.float32)
    pe = pe.at[:, 0::2].set(jnp.sin(ang))
    if d_model % 2 == 0:
        pe = pe.at[:, 1::2].set(jnp.cos(ang))
    else:
        pe = pe.at[:, 1::2].set(jnp.cos(ang[:, :-1]))
    return pe


if __name__ == "__main__":
    key = jax.random.PRNGKey(0)
    k1, k2, k3, k4 = jax.random.split(key, 4)

    # 1) Small shape consistent with the module: (batch=2, seq=8, d_model=32).
    #    Folds 4 seq rows per folded row -> lane dim 128 (unmasked stores).
    B, S, D = 2, 8, 32
    x = jax.random.normal(k1, (B, S, D), dtype=jnp.float32)
    out = jax.block_until_ready(positional_encoding(x))
    ref = x + _pe_table_reference(S, D)[None]
    assert out.shape == x.shape and out.dtype == x.dtype
    assert jnp.allclose(out, ref, rtol=1e-5, atol=1e-4), float(
        jnp.max(jnp.abs(out - ref))
    )

    # 2) Non-power-of-two d_model (fold factor 8 -> lane dim 384).
    B2, S2, D2 = 3, 200, 48
    x2 = jax.random.normal(k2, (B2, S2, D2), dtype=jnp.float32)
    out2 = jax.block_until_ready(positional_encoding(x2))
    ref2 = x2 + _pe_table_reference(S2, D2)[None]
    assert jnp.allclose(out2, ref2, rtol=1e-5, atol=1e-3), float(
        jnp.max(jnp.abs(out2 - ref2))
    )

    # 3) Odd d_model -> fallback to unfolded layout; exercises the odd-column rule.
    B3, S3, D3 = 2, 16, 33
    x3 = jax.random.normal(k3, (B3, S3, D3), dtype=jnp.float32)
    out3 = jax.block_until_ready(positional_encoding(x3))
    ref3 = x3 + _pe_table_reference(S3, D3)[None]
    assert jnp.allclose(out3, ref3, rtol=1e-5, atol=1e-3), float(
        jnp.max(jnp.abs(out3 - ref3))
    )

    # 4) Multi-block grid (batch and folded-seq tiling) with a tiny tile budget.
    B4, S4, D4 = 4, 512, 64
    x4 = jax.random.normal(k4, (B4, S4, D4), dtype=jnp.float32)
    out4 = jax.block_until_ready(positional_encoding(x4, tile_bytes_target=64 * 1024))
    ref4 = x4 + _pe_table_reference(S4, D4)[None]
    assert jnp.allclose(out4, ref4, rtol=1e-5, atol=1e-3), float(
        jnp.max(jnp.abs(out4 - ref4))
    )

    print("KERNEL_OK")
</pallas_src>

<mosaic_0001>
module attributes {stable_mosaic.version = 11 : i64} {
  func.func @_posenc_kernel(%arg0: i32, %arg1: i32, %arg2: memref<1x1x128xf32, #tpu.memory_space<vmem>>, %arg3: memref<1x1x128xf32, #tpu.memory_space<vmem>>, %arg4: memref<2x2x128xf32, #tpu.memory_space<vmem>>, %arg5: memref<2x2x128xf32, #tpu.memory_space<vmem>>) attributes {dimension_semantics = [#tpu.dimension_semantics<parallel>, #tpu.dimension_semantics<parallel>], iteration_bounds = array<i64: 1, 1>, scalar_prefetch = 0 : i64, scratch_operands = 0 : i64, tpu.core_type = #tpu.core_type<tc>, window_params = [{pipeline_mode = #tpu.pipeline_mode<synchronous>, transform_indices = @transform_0, window_bounds = array<i64: 1, 1, 128>}, {pipeline_mode = #tpu.pipeline_mode<synchronous>, transform_indices = @transform_1, window_bounds = array<i64: 1, 1, 128>}, {transform_indices = @transform_2, window_bounds = array<i64: 2, 2, 128>}, {transform_indices = @transform_3, window_bounds = array<i64: 2, 2, 128>}]} {
    %c8_i32 = arith.constant 8 : i32
    %0 = arith.muli %arg1, %c8_i32 : i32
    %1 = tpu.iota {dimensions = array<i32: 1>} : vector<1x2x128xi32>
    %c4_i32 = arith.constant 4 : i32
    %2 = vector.broadcast %c4_i32 : i32 to vector<1x2x128xi32>
    %3 = arith.muli %1, %2 : vector<1x2x128xi32>
    %4 = vector.broadcast %0 : i32 to vector<1x2x128xi32>
    %5 = arith.addi %3, %4 : vector<1x2x128xi32>
    %6 = arith.sitofp %5 : vector<1x2x128xi32> to vector<1x2x128xf32>
    %c0 = arith.constant 0 : index
    %c0_0 = arith.constant 0 : index
    %c0_1 = arith.constant 0 : index
    %7 = vector.load %arg2[%c0, %c0_0, %c0_1] : memref<1x1x128xf32, #tpu.memory_space<vmem>>, vector<1x1x128xf32>
    %8 = vector.broadcast %7 : vector<1x1x128xf32> to vector<1x2x128xf32>
    %9 = arith.mulf %6, %8 : vector<1x2x128xf32>
    %c0_2 = arith.constant 0 : index
    %c0_3 = arith.constant 0 : index
    %c0_4 = arith.constant 0 : index
    %10 = vector.load %arg3[%c0_2, %c0_3, %c0_4] : memref<1x1x128xf32, #tpu.memory_space<vmem>>, vector<1x1x128xf32>
    %11 = vector.broadcast %10 : vector<1x1x128xf32> to vector<1x2x128xf32>
    %12 = arith.addf %9, %11 : vector<1x2x128xf32>
    %13 = math.sin %12 : vector<1x2x128xf32>
    %c0_5 = arith.constant 0 : index
    %c0_6 = arith.constant 0 : index
    %c0_7 = arith.constant 0 : index
    %14 = vector.load %arg4[%c0_5, %c0_6, %c0_7] : memref<2x2x128xf32, #tpu.memory_space<vmem>>, vector<2x2x128xf32>
    %15 = vector.broadcast %13 : vector<1x2x128xf32> to vector<2x2x128xf32>
    %16 = arith.addf %14, %15 : vector<2x2x128xf32>
    %c0_8 = arith.constant 0 : index
    %c0_9 = arith.constant 0 : index
    %c0_10 = arith.constant 0 : index
    %17 = vector.load %arg5[%c0_8, %c0_9, %c0_10] : memref<2x2x128xf32, #tpu.memory_space<vmem>>, vector<2x2x128xf32>
    tpu.vector_store %arg5[%c0_8, %c0_9, %c0_10], %16 {strides = array<i32>} : memref<2x2x128xf32, #tpu.memory_space<vmem>>, vector<2x2x128xf32>,
    return
  }
  func.func @transform_0(%arg0: i32, %arg1: i32) -> (i32, i32, i32) {
    %c0_i32 = arith.constant 0 : i32
    %c0_i32_0 = arith.constant 0 : i32
    %c0_i32_1 = arith.constant 0 : i32
    %c0_i32_2 = arith.constant 0 : i32
    return %c0_i32, %c0_i32_0, %c0_i32_1 : i32, i32, i32
  }
  func.func @transform_1(%arg0: i32, %arg1: i32) -> (i32, i32, i32) {
    %c0_i32 = arith.constant 0 : i32
    %c0_i32_0 = arith.constant 0 : i32
    %c0_i32_1 = arith.constant 0 : i32
    %c0_i32_2 = arith.constant 0 : i32
    return %c0_i32, %c0_i32_0, %c0_i32_1 : i32, i32, i32
  }
  func.func @transform_2(%arg0: i32, %arg1: i32) -> (i32, i32, i32) {
    %c0_i32 = arith.constant 0 : i32
    %c0_i32_0 = arith.constant 0 : i32
    return %arg0, %arg1, %c0_i32 : i32, i32, i32
  }
  func.func @transform_3(%arg0: i32, %arg1: i32) -> (i32, i32, i32) {
    %c0_i32 = arith.constant 0 : i32
    %c0_i32_0 = arith.constant 0 : i32
    return %arg0, %arg1, %c0_i32 : i32, i32, i32
  }
}

</mosaic_0001>

<bundles_post_ra>
// kernel: tpu_custom_call.1
= control target key start
LH: loop header
LB: loop body
LE: loop exit
PB: predicated region body
PF: predicated region fallthrough
CT: control target
= control target key end

     0   :  { %8 = vsyncpa [#allocation3], 0  ;;  %s473_s0 = inlined_call_operand.hbm [shape: f32[1,1,128], index: 0, kind: input, shape index: {}]   ;;  %s474_s1 = inlined_call_operand.hbm [shape: f32[1,1,128], index: 1, kind: input, shape index: {}]   ;;  %s475_s2 = inlined_call_operand.hbm [shape: f32[2,2,128], index: 2, kind: input, shape index: {}]   ;;  %s476_s3 = inlined_call_operand.hbm [shape: f32[2,2,128], index: 3, kind: output, shape index: {}]  }
   0x1   :  { %9 = vsyncpa [#allocation6], 0  ;;  %s27_s14 = sshll.u32 %s474_s1, 4  ;;  %s28_s14 = int_to_ptr.hbm [resolvable:$true] %s27_s14 }
   0x2   :  { %10 = vsyncpa [#allocation4], 0  ;;  %s376_s15 = smov [#allocation5]   ;;  %s16_s19 = sshll.u32 %s473_s0, 4  ;;  %s17_s19 = int_to_ptr.hbm [resolvable:$true] %s16_s19 }
   0x3   :  { %s29_s16 = sshll.u32 %s376_s15, 4  ;;  %s377_s20 = smov [#allocation2]   ;;  %s30_s16 = int_to_ptr.vmem [resolvable:$true] %s29_s16 }
   0x4   :  { %32 = dma.hbm_to_vmem [thread:$0]  %s28_s14, 16, %s30_s16, [#allocation6]  }
   0x5   :  { %s18_s21 = sshll.u32 %s377_s20, 4  ;;  %s37_s24 = sshll.u32 %s475_s2, 4  ;;  %s19_s21 = int_to_ptr.vmem [resolvable:$true] %s18_s21  ;;  %s38_s24 = int_to_ptr.hbm [resolvable:$true] %s37_s24 }
   0x6   :  { %21 = dma.hbm_to_vmem [thread:$0]  %s17_s19, 16, %s19_s21, [#allocation3]  }
   0x7   :  { %s378_s1 = smov [#allocation7]   ;;  %s379_s26 = smov 32  }
   0x8   :  { %s39_s25 = sshll.u32 %s378_s1, 4  ;;  %s380_s27 = smov 2   ;;  %s40_s25 = int_to_ptr.vmem [resolvable:$true] %s39_s25 }
   0x9   :  { %45 = dma.hbm_to_vmem [thread:$0]  %s38_s24, 64, %s40_s25, [#allocation6], %s379_s26, %s379_s26, %s380_s27  }
   0xa   :  { %370 = dma.done.wait [#allocation3], 16  }
   0xb   :  { %371 = vsyncadd [#allocation3], 4294967280 }
   0xc   :  { %372 = dma.done.wait [#allocation6], 80  }
   0xd   :  { %373 = vsyncadd [#allocation6], 4294967216  ;;  %v59_v0 = vlaneseq  ;;  %v272_v4 = vld [vmem:[#allocation2] ss:$0 sm:$0xff]  ;;  %v273_v5 = vld [vmem:[#allocation5] ss:$0 sm:$0xff] }
   0xe   :  { %v381_v19 = vmov 683565275   ;;  %v382_v21 = vmov 2475754826   ;;  %v383_v23 = vmov 2131351028  }
   0xf   :  { %v60_v1 = vshrl.u32 %v59_v0, 7  ;;  %v384_v25 = vmov 2102212464   ;;  %v385_v27 = vmov 920167782   ;;  %s388_s0 = smov [#allocation8]  }
  0x10   :  { %v386_v33 = vmov 1326507024   ;;  %s240_s2 = sshll.u32 %s388_s0, 4  ;;  %s242_s30 = sshll.u32 %s476_s3, 4  ;;  %s241_s2 = int_to_ptr.vmem [resolvable:$true] %s240_s2  ;;  %s243_s30 = int_to_ptr.hbm [resolvable:$true] %s242_s30 }
  0x11   :  { %v61_v2 = vmul.u32 4, %v60_v1 }
  0x13   :  { %v64_v3 = vcvt.s32.f32 %v61_v2 }
  0x15   :  { %v69_v6 = vmul.f32 %v272_v4, %v64_v3 }
  0x17   :  { %v421_v7 = vadd.f32 %v273_v5, %v69_v6 }
  0x19   :  { %v78_v8 = vand.u32 2139095040, %v421_v7  ;;  %v75_v10 = vand.u32 2147483647, %v421_v7  ;;  %vm77_vm12 = vcmp.lt.s32.totalorder %v421_v7, 0 }
  0x1b   :  { %v79_v9 = vshrl.u32 %v78_v8, 23  ;;  %v82_v13 = vand.u32 8388607, %v75_v10  ;;  %v387_v8 = vmov 0   ;;  %vm76_vm13 = vcmp.le.f32.partialorder %v75_v10, 0.7853982 }
  0x1d   :  { %v256_v11 = vadd.s32 4294967169, %v79_v9  ;;  %v83_v16 = vor.u32 8388608, %v82_v13 }
  0x1f   :  { %v85_v12 = vadd.s32 1, %v256_v11  ;;  %v430_v35 = vshll.u32 %v83_v16, 8 }
  0x21   :  { %vm86_vm0 = vcmp.gt.s32.totalorder %v85_v12, 0  ;;  %v124_v47 = vand.u32 65535, %v430_v35  ;;  %v125_v48 = vshrl.u32 %v430_v35, 16 }
  0x22   :  { %v87_v14 = vsel %vm86_vm0, %v85_v12, 0 }
  0x23   :  { %v89_v15 = vand.u32 31, %v87_v14  ;;  %v427_v17 = vshrl.u32 %v87_v14, 5 }
  0x25   :  { %v90_v18 = vsub.s32 32, %v89_v15  ;;  %v92_v20 = vshll.u32 %v381_v19, %v89_v15  ;;  %v95_v22 = vshll.u32 %v382_v21, %v89_v15  ;;  %v98_v24 = vshll.u32 %v383_v23, %v89_v15 }
  0x26   :  { %v101_v26 = vshll.u32 %v384_v25, %v89_v15  ;;  %v104_v28 = vshll.u32 %v385_v27, %v89_v15  ;;  %vm107_vm1 = vcmp.lt.s32.totalorder %v427_v17, 1  ;;  %vm110_vm2 = vcmp.lt.s32.totalorder %v427_v17, 4 }
  0x27   :  { %v93_v29 = vshrl.u32 %v382_v21, %v90_v18  ;;  %v96_v30 = vshrl.u32 %v383_v23, %v90_v18  ;;  %v99_v31 = vshrl.u32 %v384_v25, %v90_v18  ;;  %v102_v32 = vshrl.u32 %v385_v27, %v90_v18 }
  0x28   :  { %v105_v34 = vshrl.u32 %v386_v33, %v90_v18  ;;  %vm109_vm3 = vcmp.lt.s32.totalorder %v427_v17, 3  ;;  %vm108_vm4 = vcmp.lt.s32.totalorder %v427_v17, 2  ;;  %v91_v55 = vshrl.u32 %v381_v19, %v90_v18 }
  0x29   :  { %v94_v36 = vor.u32 %v93_v29, %v92_v20  ;;  %v97_v37 = vor.u32 %v96_v30, %v95_v22  ;;  %v100_v38 = vor.u32 %v99_v31, %v98_v24  ;;  %v103_v39 = vor.u32 %v102_v32, %v101_v26 }
  0x2a   :  { %v106_v40 = vor.u32 %v105_v34, %v104_v28 }
  0x2b   :  { %v115_v41 = vsel %vm107_vm1, %v94_v36, %v97_v37  ;;  %v119_v42 = vsel %vm107_vm1, %v97_v37, %v100_v38  ;;  %v116_v43 = vsel %vm110_vm2, %v103_v39, 920167782  ;;  %v111_v4 = vsel %vm107_vm1, %v91_v55, %v94_v36 }
  0x2c   :  { %v120_v44 = vsel %vm110_vm2, %v106_v40, 1326507024  ;;  %v117_v45 = vsel %vm109_vm3, %v100_v38, %v116_v43  ;;  %v112_v6 = vsel %vm110_vm2, %v100_v38, 2102212464  ;;  %vm218_vm1 = vweird.f32 %v421_v7 }
  0x2d   :  { %v121_v46 = vsel %vm109_vm3, %v103_v39, %v120_v44  ;;  %v118_v49 = vsel %vm108_vm4, %v115_v41, %v117_v45  ;;  %v113_v19 = vsel %vm109_vm3, %v97_v37, %v112_v6 }
  0x2e   :  { %v122_v50 = vsel %vm108_vm4, %v119_v42, %v121_v46  ;;  %v148_v53 = vand.u32 65535, %v118_v49  ;;  %v149_v54 = vshrl.u32 %v118_v49, 16  ;;  %v114_v27 = vsel %vm108_vm4, %v111_v4, %v113_v19  ;;  %v230_v19 = vld [vmem:[#allocation7] sm:$0x3] }
  0x2f   :  { %v126_v51 = vand.u32 65535, %v122_v50  ;;  %v127_v52 = vshrl.u32 %v122_v50, 16  ;;  %v168_v31 = vmul.u32 %v430_v35, %v114_v27 }
  0x30   :  { %v150_v59 = vmul.u32 %v148_v53, %v124_v47  ;;  %v151_v60 = vmul.u32 %v149_v54, %v124_v47  ;;  %v152_v61 = vmul.u32 %v148_v53, %v125_v48  ;;  %v153_v1 = vmul.u32 %v149_v54, %v125_v48 }
  0x31   :  { %v128_v56 = vmul.u32 %v126_v51, %v124_v47  ;;  %v129_v57 = vmul.u32 %v127_v52, %v124_v47  ;;  %v130_v58 = vmul.u32 %v126_v51, %v125_v48  ;;  %v131_v62 = vmul.u32 %v127_v52, %v125_v48 }
  0x32   :  { %v154_v2 = vshll.u32 %v151_v60, 16  ;;  %v156_v3 = vshll.u32 %v152_v61, 16  ;;  %v155_v16 = vshrl.u32 %v151_v60, 16  ;;  %v157_v23 = vshrl.u32 %v152_v61, 16 }
  0x33   :  { %v132_v63 = vshll.u32 %v129_v57, 16  ;;  %v134_v0 = vshll.u32 %v130_v58, 16  ;;  %v133_v12 = vshrl.u32 %v129_v57, 16  ;;  %v135_v20 = vshrl.u32 %v130_v58, 16 }
  0x34   :  { %vm158_vm6 = vc.u32 %v150_v59, %v154_v2  ;;  %v160_v11 = vadd.s32 %v154_v2, %v150_v59 }
  0x35   :  { %vm136_vm5 = vc.u32 %v128_v56, %v132_v63  ;;  %v138_v5 = vadd.s32 %v132_v63, %v128_v56  ;;  %v159_v14 = vsel %vm158_vm6, 1, %v387_v8 }
  0x36   :  { %v137_v9 = vsel %vm136_vm5, 1, %v387_v8  ;;  %v161_v18 = vadd.s32 %v159_v14, %v153_v1  ;;  %vm162_vm8 = vc.u32 %v160_v11, %v156_v3  ;;  %v164_v26 = vadd.s32 %v160_v11, %v156_v3 }
  0x37   :  { %v139_v13 = vadd.s32 %v137_v9, %v131_v62  ;;  %vm140_vm7 = vc.u32 %v138_v5, %v134_v0  ;;  %v163_v22 = vsel %vm162_vm8, 1, %v387_v8 }
  0x38   :  { %v141_v15 = vsel %vm140_vm7, 1, %v387_v8  ;;  %v165_v24 = vadd.s32 %v163_v22, %v161_v18 }
  0x39   :  { %v143_v21 = vadd.s32 %v141_v15, %v139_v13 }
  0x3a   :  { %v166_v28 = vadd.s32 %v165_v24, %v155_v16 }
  0x3b   :  { %v144_v25 = vadd.s32 %v143_v21, %v133_v12 }
  0x3c   :  { %v167_v30 = vadd.s32 %v166_v28, %v157_v23 }
  0x3d   :  { %v145_v29 = vadd.s32 %v144_v25, %v135_v20  ;;  %v231_v20 = vld [vmem:[#allocation7 + $0x2] sm:$0x3] }
  0x3e   :  { %v171_v32 = vadd.s32 1, %v167_v30 }
  0x3f   :  { %vm170_vm9 = vc.u32 %v145_v29, %v164_v26  ;;  %v169_v17 = vadd.s32 %v164_v26, %v145_v29 }
  0x40   :  { %v172_v33 = vsel %vm170_vm9, %v171_v32, %v167_v30 }
  0x41   :  { %v173_v34 = vadd.s32 %v172_v33, %v168_v31 }
  0x43   :  { %v174_v36 = vadd.s32 536870912, %v173_v34 }
  0x45   :  { %v175_v37 = vshrl.u32 %v174_v36, 30 }
  0x47   :  { %v176_v38 = vshll.u32 %v175_v37, 30  ;;  %v199_v55 = vsub.s32 4, %v175_v37 }
  0x49   :  { %v177_v39 = vsub.s32 %v173_v34, %v176_v38  ;;  %v200_v58 = vsel %vm77_vm12, %v199_v55, %v175_v37 }
  0x4a   :  { %v202_v61 = vsel %vm76_vm13, 0, %v200_v58 }
  0x4b   :  { %vm178_vm10 = vcmp.lt.s32.totalorder %v177_v39, 0  ;;  %v179_v40 = vsub.s32 0, %v177_v39  ;;  %v219_v2 = vadd.s32 3, %v202_v61 }
  0x4d   :  { %v180_v41 = vsel %vm178_vm10, %v179_v40, %v177_v39  ;;  %v220_v8 = vand.u32 3, %v219_v2 }
  0x4e   :  { %v181_v42 = vclz %v180_v41 }
  0x4f   :  { %vm225_vm14 = vcmp.eq.s32.totalorder %v220_v8, 2  ;;  %vm222_vm15 = vcmp.eq.s32.totalorder %v220_v8, 0  ;;  %vm221_vm0 = vcmp.lt.s32.totalorder %v220_v8, 2 }
  0x50   :  { %v257_v43 = vadd.s32 4294967294, %v181_v42 }
  0x52   :  { %vm258_vm11 = vcmp.lt.s32.totalorder %v257_v43, 0 }
  0x53   :  { %v184_v44 = vsel %vm258_vm11, 0, %v257_v43 }
  0x54   :  { %v185_v45 = vsub.s32 32, %v184_v44  ;;  %v186_v46 = vshll.u32 %v177_v39, %v184_v44  ;;  %v189_v47 = vsub.s32 4294967266, %v184_v44 }
  0x56   :  { %v187_v35 = vshrl.u32 %v169_v17, %v185_v45  ;;  %v190_v48 = vadd.s32 127, %v189_v47 }
  0x58   :  { %v188_v49 = vor.u32 %v187_v35, %v186_v46  ;;  %v191_v50 = vshll.u32 %v190_v48, 23 }
  0x5a   :  { %v192_v51 = vor.u32 4788187, %v191_v50  ;;  %v195_v52 = vcvt.s32.f32 %v188_v49 }
  0x5c   :  { %v193_v53 = vand.u32 2147483647, %v192_v51 }
  0x5e   :  { %v196_v54 = vmul.f32 %v195_v52, %v193_v53 }
  0x60   :  { %v197_v56 = vxor.u32 2147483648, %v196_v54 }
  0x62   :  { %v198_v57 = vsel %vm77_vm12, %v197_v56, %v196_v54 }
  0x63   :  { %v201_v59 = vsel %vm76_vm13, %v421_v7, %v198_v57 }
  0x64   :  { %v203_v60 = vmul.f32 %v201_v59, %v201_v59 }
  0x66   :  { %v204_v62 = vmul.f32 -0.001358992, %v203_v60  ;;  %v211_v63 = vmul.f32 -0.00019511016, %v203_v60 }
  0x68   :  { %v205_v0 = vadd.f32 0.041655596, %v204_v62  ;;  %v212_v1 = vadd.f32 0.008332121, %v211_v63 }
  0x6a   :  { %v206_v3 = vmul.f32 %v205_v0, %v203_v60  ;;  %v213_v4 = vmul.f32 %v212_v1, %v203_v60 }
  0x6c   :  { %v207_v5 = vadd.f32 -0.4999988, %v206_v3  ;;  %v214_v6 = vadd.f32 -0.16666654, %v213_v4 }
  0x6e   :  { %v208_v9 = vmul.f32 %v207_v5, %v203_v60  ;;  %v215_v11 = vmul.f32 %v214_v6, %v203_v60 }
  0x70   :  { %v209_v10 = vadd.f32 1.0, %v208_v9  ;;  %v216_v12 = vadd.f32 1.0, %v215_v11 }
  0x72   :  { %v217_v13 = vmul.f32 %v216_v12, %v201_v59  ;;  %v226_v14 = vxor.u32 2147483648, %v209_v10 }
  0x74   :  { %v223_v15 = vxor.u32 2147483648, %v217_v13  ;;  %v227_v16 = vsel %vm225_vm14, %v226_v14, %v217_v13 }
  0x76   :  { %v224_v18 = vsel %vm222_vm15, %v209_v10, %v223_v15 }
  0x77   :  { %v228_v21 = vsel %vm221_vm0, %v224_v18, %v227_v16 }
  0x78   :  { %v229_v22 = vsel %vm218_vm1, nan, %v228_v21 }
  0x79   :  { %v232_v23 = vadd.f32 %v230_v19, %v229_v22  ;;  %v233_v24 = vadd.f32 %v231_v20, %v229_v22 }
  0x7b   :  { %234 = vst [vmem:[#allocation8] sm:$0x3] %v232_v23 }
  0x7c   :  { %235 = vst [vmem:[#allocation8 + $0x2] sm:$0x3] %v233_v24 }
  0x7d   :  { %248 = dma.vmem_to_hbm [thread:$0]  %s241_s2, 64, %s243_s30, [#allocation4], %s379_s26, %s379_s26, %s380_s27  }
  0x7e   :  { %374 = dma.done.wait [#allocation4], 64  }
  0x7f   :  { %375 = vsyncadd [#allocation4], 4294967232 }
  0x80   :  { %253 = vsyncpa [#allocation3], 1 }
  0x81   :  { %254 = vsyncpa [#allocation6], 1 }
  0x82   :  { %255 = vsyncpa [#allocation4], 1 }

</bundles_post_ra>
